<compile_context>
chip_gen: v6e
topology: v6e:2x2x1
jax: 0.10.0
libtpu: 0.0.40
codegen_flags: <defaults>
</compile_context>

<pallas_src>
import math

import jax
import jax.numpy as jnp
from jax.experimental import pallas as pl
from jax.experimental.pallas import tpu as pltpu

_EPS = 1e-6
_MAX_LANE_W = 4096            # lane-width cap (keeps double-buffered tiles sane)
_MAX_TILE_ELEMS = 384 * 1024  # per-input tile elements (~1.5 MiB f32)
_VMEM_LIMIT_BYTES = 32 << 20


def _round_up(a: int, b: int) -> int:
    return ((a + b - 1) // b) * b


def _choose_lane_width(n: int, c: int):
    """Pick the lane-dense slab width for the row-major flattened inputs.

    Preference order:
      1) widths c*k (k | n, multiple of 128) whose row count is a multiple of 8
         -> fully zero-copy reshape, no jnp.pad at all
      2) same family, rows not a multiple of 8     -> small row pad (one copy)
      3) lcm(128, c)                                -> flat-tail pad (one copy)
      4) None: lcm explodes (awkward class counts)  -> caller pads the class
         axis to a multiple of 128 with zero-weighted lanes instead.
    """
    total = n * c
    best = None
    for k in range(1, n + 1):
        w = c * k
        if w > _MAX_LANE_W:
            break
        if n % k or w % 128:
            continue
        rows = total // w
        key = (0 if rows % 8 == 0 else 1, abs(w - 1024))
        if best is None or key < best[0]:
            best = (key, w)
    if best is not None:
        return best[1]
    w = (128 * c) // math.gcd(128, c)          # lcm(128, c)
    if w > _MAX_LANE_W:
        return None
    if w < 512 and total >= 512:
        w *= 512 // w
    return w


def _max_tile_rows(lane_w: int) -> int:
    return max(8, ((_MAX_TILE_ELEMS // lane_w) // 8) * 8)


def _divisor_tile_rows(rows: int, cap: int) -> int:
    """Largest multiple-of-8 divisor of `rows` that is <= cap (rows % 8 == 0)."""
    d = min(cap, rows)
    d -= d % 8
    while d >= 8:
        if rows % d == 0:
            return d
        d -= 8
    return 8


def _bce_tile(x, t, fast_math):
    if fast_math:
        # Logits-space identity: -(t*log(s) + (1-t)*log(1-s)) == softplus(x) - t*x
        # Halves the EUP transcendental count; differs from the +1e-6 reference
        # only for saturated |x| >~ 13.
        return jax.nn.softplus(x) - t * x
    probs = jax.nn.sigmoid(x)
    return -(t * jnp.log(probs + _EPS) + (1.0 - t) * jnp.log(1.0 - probs + _EPS))


def _make_reduce_kernel(tile_rows, lane_w, n_inner, first_unsafe_tile,
                        mask_mode, valid_rows, tail_cols, fast_math):
    """Sum-reduction kernel over a (slab_rows, lane_w) slab.

    Grid is (P, n_inner); each leading-axis index p owns an independent partial
    sum (megacore split on v7x, plain sequential loop elsewhere).  Tiles with
    global index >= first_unsafe_tile may contain padded / replicated elements
    and are masked; all other tiles take the cheap unmasked path.
    """
    n_stripes = tile_rows // 8

    def kernel(x_ref, t_ref, w_ref, out_ref, acc_ref):
        i = pl.program_id(1)
        g = pl.program_id(0) * n_inner + i

        @pl.when(i == 0)
        def _init():
            acc_ref[...] = jnp.zeros_like(acc_ref)

        x = x_ref[...].astype(jnp.float32)
        t = t_ref[...].astype(jnp.float32)
        bce = _bce_tile(x, t, fast_math)

        unsafe = g >= first_unsafe_tile

        @pl.when(jnp.logical_not(unsafe))
        def _bulk():
            # Stripe-reduce (free, aligned with the (8,128) tiling) then one
            # VALU add into the small (8, lane_w) accumulator.
            acc_ref[...] += bce.reshape(n_stripes, 8, lane_w).sum(axis=0)

        @pl.when(unsafe)
        def _masked():
            row = jax.lax.broadcasted_iota(jnp.int32, (tile_rows, lane_w), 0)
            grow = g * tile_rows + row
            if mask_mode == "flat":
                col = jax.lax.broadcasted_iota(jnp.int32, (tile_rows, lane_w), 1)
                valid = (grow < valid_rows) | ((grow == valid_rows) & (col < tail_cols))
            else:  # "rows": whole rows are valid / invalid
                valid = grow < valid_rows
            masked = jnp.where(valid, bce, 0.0)
            acc_ref[...] += masked.reshape(n_stripes, 8, lane_w).sum(axis=0)

        @pl.when(i == n_inner - 1)
        def _finalize():
            # Per-class weights depend only on the lane (lane_w % C == 0), so
            # they are applied once to the (8, lane_w) accumulator, and the
            # single XLU reduce happens once per partition.
            weighted = acc_ref[...] * w_ref[...].astype(jnp.float32)
            part = jnp.sum(weighted, keepdims=True)            # (1, 1)
            out_ref[...] = jnp.broadcast_to(part, (1, 128))

    return kernel


def _make_elementwise_kernel(fast_math):
    def kernel(x_ref, t_ref, w_ref, out_ref):
        x = x_ref[...].astype(jnp.float32)
        t = t_ref[...].astype(jnp.float32)
        bce = _bce_tile(x, t, fast_math)
        out_ref[...] = (bce * w_ref[...].astype(jnp.float32)).astype(out_ref.dtype)
    return kernel


def weighted_bce_loss(logits, targets, weights=None, reduction="mean",
                      *, fast_math=False, max_tile_rows=None):
    """Pallas TPU implementation of WeightedBCELoss.forward."""
    logits = jnp.asarray(logits)
    targets = jnp.asarray(targets)
    if logits.ndim == 1:
        logits = logits[None, :]
    if targets.ndim == 1:
        targets = targets[None, :]
    if targets.shape[1] != logits.shape[1]:
        raise ValueError(
            f"Number of classes in targets ({targets.shape[1]}) must match "
            f"logits ({logits.shape[1]})")
    n, c = logits.shape
    targets = targets.astype(logits.dtype)

    if weights is not None:
        weights = jnp.asarray(weights, dtype=jnp.float32).reshape(-1)
        if weights.shape[0] != c:
            raise ValueError(
                f"Length of weights ({weights.shape[0]}) must match number of "
                f"classes ({c})")

    total = n * c
    itemsize = jnp.dtype(logits.dtype).itemsize
    w_src = weights if weights is not None else jnp.ones((c,), jnp.float32)

    lane_w = _choose_lane_width(n, c)
    if lane_w is not None:
        # ----- flat lane-dense layout: row-major flatten to (rows, lane_w) ----
        mask_mode = "flat"
        rows = -(-total // lane_w)
        valid_rows, tail_cols = total // lane_w, total % lane_w
        cap = max_tile_rows if max_tile_rows is not None else _max_tile_rows(lane_w)
        cap = max(8, (cap // 8) * 8)
        zero_copy = (total % lane_w == 0) and (rows % 8 == 0)
        if zero_copy:
            # Pure reshape of the inputs -- no host-side copy at all.
            tile_rows = rows if rows <= cap else _divisor_tile_rows(rows, cap)
            slab_rows = rows
            x_slab = logits.reshape(slab_rows, lane_w)
            t_slab = targets.reshape(slab_rows, lane_w)
        else:
            # A copy is unavoidable here; pad rows to a tile multiple so no
            # block is ever ragged (padded tail is masked in-kernel).
            tile_rows = min(cap, _round_up(rows, 8))
            slab_rows = _round_up(rows, tile_rows)
            pad = slab_rows * lane_w - total
            x_slab = jnp.pad(logits.reshape(-1), (0, pad)).reshape(slab_rows, lane_w)
            t_slab = jnp.pad(targets.reshape(-1), (0, pad)).reshape(slab_rows, lane_w)
        # Row-major flatten => class = flat_index % C; lane_w % C == 0 makes the
        # per-class weight a pure function of the lane.
        w_row = jnp.tile(w_src, lane_w // c).reshape(1, lane_w)
    else:
        # ----- pathological lcm(128, C): pad the class axis to a multiple of
        #       128 with zero-weighted lanes (bounded lane width; one copy) ----
        mask_mode = "rows"
        lane_w = _round_up(c, 128)
        cap = max_tile_rows if max_tile_rows is not None else _max_tile_rows(lane_w)
        cap = max(8, (cap // 8) * 8)
        tile_rows = min(cap, _round_up(n, 8))
        slab_rows = _round_up(n, tile_rows)
        x_slab = jnp.pad(logits, ((0, slab_rows - n), (0, lane_w - c)))
        t_slab = jnp.pad(targets, ((0, slab_rows - n), (0, lane_w - c)))
        w_row = jnp.concatenate(
            [w_src, jnp.zeros((lane_w - c,), jnp.float32)]).reshape(1, lane_w)
        valid_rows, tail_cols = n, 0

    n_tiles = slab_rows // tile_rows
    tile_elems = tile_rows * lane_w
    if mask_mode == "flat":
        first_unsafe = total // tile_elems
    else:
        first_unsafe = valid_rows // tile_rows

    if reduction in ("mean", "sum"):
        num_parts = 2 if n_tiles >= 2 else 1          # use both v7x TensorCores
        n_inner = -(-n_tiles // num_parts)

        def x_map(p, i):
            # Clamp so the (at most one) extra tile created by the parallel
            # split re-reads valid memory; its contribution is masked to 0.
            return (jnp.minimum(p * n_inner + i, n_tiles - 1), 0)

        kernel = _make_reduce_kernel(tile_rows, lane_w, n_inner, first_unsafe,
                                     mask_mode, valid_rows, tail_cols, fast_math)
        cost = pl.CostEstimate(
            flops=10 * total,
            transcendentals=4 * total,
            bytes_accessed=2 * slab_rows * lane_w * itemsize + 4 * lane_w
                           + 512 * num_parts)
        partials = pl.pallas_call(
            kernel,
            out_shape=jax.ShapeDtypeStruct((1, 128 * num_parts), jnp.float32),
            grid_spec=pltpu.PrefetchScalarGridSpec(
                num_scalar_prefetch=0,
                grid=(num_parts, n_inner),
                in_specs=[
                    pl.BlockSpec((tile_rows, lane_w), x_map),
                    pl.BlockSpec((tile_rows, lane_w), x_map),
                    pl.BlockSpec((1, lane_w), lambda p, i: (0, 0)),
                ],
                out_specs=pl.BlockSpec((1, 128), lambda p, i: (0, p)),
                scratch_shapes=[pltpu.VMEM((8, lane_w), jnp.float32)],
            ),
            compiler_params=pltpu.CompilerParams(
                dimension_semantics=("parallel", "arbitrary"),
                vmem_limit_bytes=_VMEM_LIMIT_BYTES),
            cost_estimate=cost,
        )(x_slab, t_slab, w_row)

        loss = jnp.sum(partials[0, ::128])
        if reduction == "mean":
            loss = loss / total
        return loss

    # Anything else mirrors the module's `else` branch: unreduced bce.
    # torch promotion: weighted 'none' is f32 (weights are f32); unweighted
    # keeps the input dtype (halves HBM writeback for bf16 inputs).
    out_dtype = jnp.float32 if weights is not None else logits.dtype
    kernel = _make_elementwise_kernel(fast_math)
    cost = pl.CostEstimate(
        flops=10 * total,
        transcendentals=4 * total,
        bytes_accessed=(2 * itemsize + jnp.dtype(out_dtype).itemsize)
                       * slab_rows * lane_w + 4 * lane_w)
    out = pl.pallas_call(
        kernel,
        out_shape=jax.ShapeDtypeStruct((slab_rows, lane_w), out_dtype),
        grid_spec=pltpu.PrefetchScalarGridSpec(
            num_scalar_prefetch=0,
            grid=(n_tiles,),
            in_specs=[
                pl.BlockSpec((tile_rows, lane_w), lambda i: (i, 0)),
                pl.BlockSpec((tile_rows, lane_w), lambda i: (i, 0)),
                pl.BlockSpec((1, lane_w), lambda i: (0, 0)),
            ],
            out_specs=pl.BlockSpec((tile_rows, lane_w), lambda i: (i, 0)),
        ),
        compiler_params=pltpu.CompilerParams(
            dimension_semantics=("parallel",),
            vmem_limit_bytes=_VMEM_LIMIT_BYTES),
        cost_estimate=cost,
    )(x_slab, t_slab, w_row)
    if mask_mode == "flat":
        return out.reshape(-1)[:total].reshape(n, c)
    return out[:n, :c]


def _reference(logits, targets, weights=None, reduction="mean"):
    x = jnp.asarray(logits, jnp.float32)
    t = jnp.asarray(targets, jnp.float32)
    probs = jax.nn.sigmoid(x)
    bce = -(t * jnp.log(probs + _EPS) + (1.0 - t) * jnp.log(1.0 - probs + _EPS))
    if weights is not None:
        bce = bce * jnp.asarray(weights, jnp.float32).reshape(1, -1)
    if reduction == "mean":
        return jnp.mean(bce)
    if reduction == "sum":
        return jnp.sum(bce)
    return bce


if __name__ == "__main__":
    key = jax.random.PRNGKey(0)
    k1, k2, k3, k4, k5, k6 = jax.random.split(key, 6)

    # --- primary case: small multi-label head (batch=8, classes=4) -----------
    N, C = 8, 4
    logits = jax.random.normal(k1, (N, C), dtype=jnp.float32)
    targets = jax.random.bernoulli(k2, p=0.5, shape=(N, C)).astype(jnp.float32)
    class_w = jnp.array([1.0, 2.0, 0.5, 1.5], dtype=jnp.float32)

    loss = weighted_bce_loss(logits, targets, class_w, reduction="mean")
    jax.block_until_ready(loss)
    assert jnp.allclose(loss, _reference(logits, targets, class_w, "mean"),
                        rtol=1e-5, atol=1e-6)

    loss_s = weighted_bce_loss(logits, targets, class_w, reduction="sum")
    assert jnp.allclose(loss_s, _reference(logits, targets, class_w, "sum"),
                        rtol=1e-5, atol=1e-5)

    loss_u = weighted_bce_loss(logits, targets, None, reduction="mean")
    assert jnp.allclose(loss_u, _reference(logits, targets, None, "mean"),
                        rtol=1e-5, atol=1e-6)

    loss_n = weighted_bce_loss(logits, targets, class_w, reduction="none")
    assert jnp.allclose(loss_n, _reference(logits, targets, class_w, "none"),
                        rtol=1e-5, atol=1e-6)

    # --- zero-copy path + two-partition split + clamped/masked extra tile ----
    N2, C2 = 24, 4096
    logits2 = jax.random.normal(k3, (N2, C2), dtype=jnp.float32)
    targets2 = jax.random.bernoulli(k4, p=0.3, shape=(N2, C2)).astype(jnp.float32)
    w2 = 0.5 + (jnp.arange(C2, dtype=jnp.float32) % 7) * 0.25
    loss2 = weighted_bce_loss(logits2, targets2, w2, reduction="mean",
                              max_tile_rows=8)   # forces 3 tiles, 2 partitions
    assert jnp.allclose(loss2, _reference(logits2, targets2, w2, "mean"),
                        rtol=1e-5, atol=1e-6)

    # --- class-padded fallback for awkward class counts ----------------------
    N3, C3 = 6, 130
    logits3 = jax.random.normal(k5, (N3, C3), dtype=jnp.float32)
    targets3 = jax.random.bernoulli(k6, p=0.5, shape=(N3, C3)).astype(jnp.float32)
    w3 = 0.25 + (jnp.arange(C3, dtype=jnp.float32) % 5) * 0.5
    loss3 = weighted_bce_loss(logits3, targets3, w3, reduction="sum")
    assert jnp.allclose(loss3, _reference(logits3, targets3, w3, "sum"),
                        rtol=1e-5, atol=1e-4)

    # --- bf16 inputs (halved HBM traffic; f32 in-kernel compute) -------------
    logits_bf = logits.astype(jnp.bfloat16)
    targets_bf = targets.astype(jnp.bfloat16)
    loss_bf = weighted_bce_loss(logits_bf, targets_bf, class_w, reduction="mean")
    assert jnp.allclose(loss_bf, _reference(logits_bf, targets_bf, class_w, "mean"),
                        rtol=1e-5, atol=1e-5)

    jax.block_until_ready((loss, loss_s, loss_u, loss_n, loss2, loss3, loss_bf))
    print("KERNEL_OK")
</pallas_src>

<mosaic_0001>
module attributes {stable_mosaic.version = 11 : i64} {
  func.func @kernel(%arg0: i32, %arg1: i32, %arg2: memref<8x128xf32, #tpu.memory_space<vmem>>, %arg3: memref<8x128xf32, #tpu.memory_space<vmem>>, %arg4: memref<1x128xf32, #tpu.memory_space<vmem>>, %arg5: memref<1x128xf32, #tpu.memory_space<vmem>>, %arg6: memref<8x128xf32, #tpu.memory_space<vmem>>) attributes {dimension_semantics = [#tpu.dimension_semantics<parallel>, #tpu.dimension_semantics<arbitrary>], iteration_bounds = array<i64: 1, 1>, scalar_prefetch = 0 : i64, scratch_operands = 1 : i64, tpu.core_type = #tpu.core_type<tc>, window_params = [{transform_indices = @transform_0, window_bounds = array<i64: 8, 128>}, {transform_indices = @transform_1, window_bounds = array<i64: 8, 128>}, {pipeline_mode = #tpu.pipeline_mode<synchronous>, transform_indices = @transform_2, window_bounds = array<i64: 1, 128>}, {transform_indices = @transform_3, window_bounds = array<i64: 1, 128>}]} {
    %c1_i32 = arith.constant 1 : i32
    %0 = arith.muli %arg0, %c1_i32 : i32
    %1 = arith.addi %0, %arg1 : i32
    %c0_i32 = arith.constant 0 : i32
    %2 = arith.cmpi eq, %arg1, %c0_i32 : i32
    %3 = arith.extui %2 : i1 to i32
    %c0_i32_0 = arith.constant 0 : i32
    %4 = arith.cmpi ne, %3, %c0_i32_0 : i32
    scf.if %4 {
      %cst_14 = arith.constant 0.000000e+00 : f32
      %36 = vector.broadcast %cst_14 : f32 to vector<8x128xf32>
      %c0_15 = arith.constant 0 : index
      %c0_16 = arith.constant 0 : index
      %37 = vector.load %arg6[%c0_15, %c0_16] : memref<8x128xf32, #tpu.memory_space<vmem>>, vector<8x128xf32>
      tpu.vector_store %arg6[%c0_15, %c0_16], %36 {strides = array<i32>} : memref<8x128xf32, #tpu.memory_space<vmem>>, vector<8x128xf32>,
    } else {
    }
    %c0 = arith.constant 0 : index
    %c0_1 = arith.constant 0 : index
    %5 = vector.load %arg2[%c0, %c0_1] : memref<8x128xf32, #tpu.memory_space<vmem>>, vector<8x128xf32>
    %c0_2 = arith.constant 0 : index
    %c0_3 = arith.constant 0 : index
    %6 = vector.load %arg3[%c0_2, %c0_3] : memref<8x128xf32, #tpu.memory_space<vmem>>, vector<8x128xf32>
    %7 = arith.negf %5 : vector<8x128xf32>
    %8 = math.exp %7 : vector<8x128xf32>
    %cst = arith.constant 1.000000e+00 : f32
    %9 = vector.broadcast %cst : f32 to vector<8x128xf32>
    %10 = arith.addf %9, %8 : vector<8x128xf32>
    %11 = arith.divf %9, %10 : vector<8x128xf32>
    %cst_4 = arith.constant 9.99999997E-7 : f32
    %12 = vector.broadcast %cst_4 : f32 to vector<8x128xf32>
    %13 = arith.addf %11, %12 : vector<8x128xf32>
    %14 = math.log %13 : vector<8x128xf32>
    %15 = arith.mulf %6, %14 : vector<8x128xf32>
    %cst_5 = arith.constant 1.000000e+00 : f32
    %16 = vector.broadcast %cst_5 : f32 to vector<8x128xf32>
    %17 = arith.subf %16, %6 : vector<8x128xf32>
    %cst_6 = arith.constant 1.000000e+00 : f32
    %18 = vector.broadcast %cst_6 : f32 to vector<8x128xf32>
    %19 = arith.subf %18, %11 : vector<8x128xf32>
    %cst_7 = arith.constant 9.99999997E-7 : f32
    %20 = vector.broadcast %cst_7 : f32 to vector<8x128xf32>
    %21 = arith.addf %19, %20 : vector<8x128xf32>
    %22 = math.log %21 : vector<8x128xf32>
    %23 = arith.mulf %17, %22 : vector<8x128xf32>
    %24 = arith.addf %15, %23 : vector<8x128xf32>
    %cst_8 = arith.constant 0.000000e+00 : f32
    %25 = vector.broadcast %cst_8 : f32 to vector<8x128xf32>
    %26 = arith.subf %25, %24 : vector<8x128xf32>
    %c0_i32_9 = arith.constant 0 : i32
    %27 = arith.cmpi sge, %1, %c0_i32_9 : i32
    %true = arith.constant true
    %28 = arith.xori %27, %true : i1
    %29 = arith.extui %28 : i1 to i32
    %c0_i32_10 = arith.constant 0 : i32
    %30 = arith.cmpi ne, %29, %c0_i32_10 : i32
    scf.if %30 {
      %c0_14 = arith.constant 0 : index
      %c0_15 = arith.constant 0 : index
      %36 = vector.load %arg6[%c0_14, %c0_15] : memref<8x128xf32, #tpu.memory_space<vmem>>, vector<8x128xf32>
      %37 = vector.shape_cast %26 : vector<8x128xf32> to vector<1x8x128xf32>
      %cst_16 = arith.constant dense<0.000000e+00> : vector<8x128xf32>
      %38 = vector.multi_reduction <add>, %37, %cst_16 [0] : vector<1x8x128xf32> to vector<8x128xf32>
      %39 = arith.addf %36, %38 : vector<8x128xf32>
      %c0_17 = arith.constant 0 : index
      %c0_18 = arith.constant 0 : index
      %40 = vector.load %arg6[%c0_17, %c0_18] : memref<8x128xf32, #tpu.memory_space<vmem>>, vector<8x128xf32>
      tpu.vector_store %arg6[%c0_17, %c0_18], %39 {strides = array<i32>} : memref<8x128xf32, #tpu.memory_space<vmem>>, vector<8x128xf32>,
    } else {
    }
    %31 = arith.extui %27 : i1 to i32
    %c0_i32_11 = arith.constant 0 : i32
    %32 = arith.cmpi ne, %31, %c0_i32_11 : i32
    scf.if %32 {
      %36 = tpu.iota {dimensions = array<i32: 0>} : vector<8x128xi32>
      %c8_i32 = arith.constant 8 : i32
      %37 = arith.muli %1, %c8_i32 : i32
      %38 = vector.broadcast %37 : i32 to vector<8x128xi32>
      %39 = arith.addi %38, %36 : vector<8x128xi32>
      %40 = tpu.iota {dimensions = array<i32: 1>} : vector<8x128xi32>
      %c0_i32_14 = arith.constant 0 : i32
      %41 = vector.broadcast %c0_i32_14 : i32 to vector<8x128xi32>
      %42 = arith.cmpi slt, %39, %41 : vector<8x128xi32>
      %c0_i32_15 = arith.constant 0 : i32
      %43 = vector.broadcast %c0_i32_15 : i32 to vector<8x128xi32>
      %44 = arith.cmpi eq, %39, %43 : vector<8x128xi32>
      %c32_i32 = arith.constant 32 : i32
      %45 = vector.broadcast %c32_i32 : i32 to vector<8x128xi32>
      %46 = arith.cmpi slt, %40, %45 : vector<8x128xi32>
      %47 = arith.andi %44, %46 : vector<8x128xi1>
      %48 = arith.ori %42, %47 : vector<8x128xi1>
      %cst_16 = arith.constant 0.000000e+00 : f32
      %49 = vector.broadcast %cst_16 : f32 to vector<8x128xf32>
      %50 = arith.select %48, %26, %49 : vector<8x128xi1>, vector<8x128xf32>
      %c0_17 = arith.constant 0 : index
      %c0_18 = arith.constant 0 : index
      %51 = vector.load %arg6[%c0_17, %c0_18] : memref<8x128xf32, #tpu.memory_space<vmem>>, vector<8x128xf32>
      %52 = vector.shape_cast %50 : vector<8x128xf32> to vector<1x8x128xf32>
      %cst_19 = arith.constant dense<0.000000e+00> : vector<8x128xf32>
      %53 = vector.multi_reduction <add>, %52, %cst_19 [0] : vector<1x8x128xf32> to vector<8x128xf32>
      %54 = arith.addf %51, %53 : vector<8x128xf32>
      %c0_20 = arith.constant 0 : index
      %c0_21 = arith.constant 0 : index
      %55 = vector.load %arg6[%c0_20, %c0_21] : memref<8x128xf32, #tpu.memory_space<vmem>>, vector<8x128xf32>
      tpu.vector_store %arg6[%c0_20, %c0_21], %54 {strides = array<i32>} : memref<8x128xf32, #tpu.memory_space<vmem>>, vector<8x128xf32>,
    } else {
    }
    %c0_i32_12 = arith.constant 0 : i32
    %33 = arith.cmpi eq, %arg1, %c0_i32_12 : i32
    %34 = arith.extui %33 : i1 to i32
    %c0_i32_13 = arith.constant 0 : i32
    %35 = arith.cmpi ne, %34, %c0_i32_13 : i32
    scf.if %35 {
      %c0_14 = arith.constant 0 : index
      %c0_15 = arith.constant 0 : index
      %36 = vector.load %arg6[%c0_14, %c0_15] : memref<8x128xf32, #tpu.memory_space<vmem>>, vector<8x128xf32>
      %c0_16 = arith.constant 0 : index
      %c0_17 = arith.constant 0 : index
      %37 = vector.load %arg4[%c0_16, %c0_17] : memref<1x128xf32, #tpu.memory_space<vmem>>, vector<1x128xf32>
      %38 = vector.broadcast %37 : vector<1x128xf32> to vector<8x128xf32>
      %39 = arith.mulf %36, %38 : vector<8x128xf32>
      %40 = vector.shape_cast %39 : vector<8x128xf32> to vector<1x8x128xf32>
      %cst_18 = arith.constant dense<0.000000e+00> : vector<1xf32>
      %41 = vector.multi_reduction <add>, %40, %cst_18 [1, 2] : vector<1x8x128xf32> to vector<1xf32>
      %42 = vector.shape_cast %41 : vector<1xf32> to vector<1x1x1xf32>
      %43 = vector.extract %42[0, 0, 0] : f32 from vector<1x1x1xf32>
      %44 = vector.broadcast %43 : f32 to vector<1x1xf32>
      %45 = vector.shape_cast %44 : vector<1x1xf32> to vector<1x1xf32>
      %46 = vector.broadcast %45 : vector<1x1xf32> to vector<1x128xf32>
      %c0_19 = arith.constant 0 : index
      %c0_20 = arith.constant 0 : index
      %47 = vector.load %arg5[%c0_19, %c0_20] : memref<1x128xf32, #tpu.memory_space<vmem>>, vector<1x128xf32>
      tpu.vector_store %arg5[%c0_19, %c0_20], %46 {strides = array<i32>} : memref<1x128xf32, #tpu.memory_space<vmem>>, vector<1x128xf32>,
    } else {
    }
    return
  }
  func.func @transform_0(%arg0: i32, %arg1: i32) -> (i32, i32) {
    %c1_i32 = arith.constant 1 : i32
    %0 = arith.muli %arg0, %c1_i32 : i32
    %1 = arith.addi %0, %arg1 : i32
    %c0_i32 = arith.constant 0 : i32
    %2 = arith.minsi %1, %c0_i32 : i32
    %c0_i32_0 = arith.constant 0 : i32
    %c0_i32_1 = arith.constant 0 : i32
    return %2, %c0_i32_0 : i32, i32
  }
  func.func @transform_1(%arg0: i32, %arg1: i32) -> (i32, i32) {
    %c1_i32 = arith.constant 1 : i32
    %0 = arith.muli %arg0, %c1_i32 : i32
    %1 = arith.addi %0, %arg1 : i32
    %c0_i32 = arith.constant 0 : i32
    %2 = arith.minsi %1, %c0_i32 : i32
    %c0_i32_0 = arith.constant 0 : i32
    %c0_i32_1 = arith.constant 0 : i32
    return %2, %c0_i32_0 : i32, i32
  }
  func.func @transform_2(%arg0: i32, %arg1: i32) -> (i32, i32) {
    %c0_i32 = arith.constant 0 : i32
    %c0_i32_0 = arith.constant 0 : i32
    %c0_i32_1 = arith.constant 0 : i32
    return %c0_i32, %c0_i32_0 : i32, i32
  }
  func.func @transform_3(%arg0: i32, %arg1: i32) -> (i32, i32) {
    %c0_i32 = arith.constant 0 : i32
    %c0_i32_0 = arith.constant 0 : i32
    return %c0_i32, %arg0 : i32, i32
  }
}

</mosaic_0001>

<bundles_post_ra>
// kernel: tpu_custom_call.1
= control target key start
LH: loop header
LB: loop body
LE: loop exit
PB: predicated region body
PF: predicated region fallthrough
CT: control target
= control target key end

     0   :  { %8 = vsyncpa [#allocation4], 0  ;;  %s269_s0 = inlined_call_operand.hbm [shape: f32[8,128], index: 0, kind: input, shape index: {}]   ;;  %s270_s1 = inlined_call_operand.hbm [shape: f32[8,128], index: 1, kind: input, shape index: {}]   ;;  %s271_s2 = inlined_call_operand.vmem [shape: f32[1,128], index: 2, kind: input, shape index: {}]   ;;  %s272_s3 = inlined_call_operand.hbm [shape: f32[1,128], index: 3, kind: output, shape index: {}]  }
   0x1   :  { %9 = vsyncpa [#allocation7], 0 }
   0x2   :  { %10 = vsyncpa [#allocation5], 0  ;;  %s234_s12 = smov [#allocation3]   ;;  %s235_s14 = smov [#allocation6]  }
   0x3   :  { %s22_s13 = sshll.u32 %s234_s12, 4  ;;  %s37_s15 = sshll.u32 %s235_s14, 4  ;;  %s23_s13 = int_to_ptr.vmem [resolvable:$true] %s22_s13  ;;  %s38_s15 = int_to_ptr.vmem [resolvable:$true] %s37_s15 }
   0x4   :  { %s176_s16 = scalar_lea.vmem %s23_s13, 128  ;;  %p181_p1 = scmp.lt.s32.totalorder %s23_s13, %s23_s13 }
   0x5   :  { %p177_p0 = scmp.ne.s32.totalorder %s23_s13, %s176_s16  ;;  %p182_p2 = scmp.lt.s32.totalorder %s176_s16, %s176_s16 }
   0x7   :  { %p183_p3 = por %p182_p2, %p181_p1 }
   0x9   :  { %p184_p4 = pnand %p183_p3, %p177_p0 }
   0xb   :  { %187 = shalt.err (!%p184_p4)
}
   0xc   :  { %25 = dma.hbm_to_vmem [thread:$0]  %s269_s0, 128, %s23_s13, [#allocation4]  }
   0xd   :  { %s196_s19 = scalar_lea.vmem %s38_s15, 128  ;;  %p201_p6 = scmp.lt.s32.totalorder %s38_s15, %s38_s15 }
   0xe   :  { %p197_p5 = scmp.ne.s32.totalorder %s38_s15, %s196_s19  ;;  %p202_p7 = scmp.lt.s32.totalorder %s196_s19, %s196_s19 }
  0x10   :  { %p203_p8 = por %p202_p7, %p201_p6 }
  0x12   :  { %p204_p9 = pnand %p203_p8, %p197_p5 }
  0x14   :  { %207 = shalt.err (!%p204_p9)
}
  0x15   :  { %40 = dma.hbm_to_vmem [thread:$0]  %s270_s1, 128, %s38_s15, [#allocation7]  }
  0x16   :  { %228 = dma.done.wait [#allocation4], 128  }
  0x17   :  { %229 = vsyncadd [#allocation4], 4294967168 }
  0x18   :  { %230 = dma.done.wait [#allocation7], 128  }
  0x19   :  { %231 = vsyncadd [#allocation7], 4294967168  ;;  %v61_v0 = vld [vmem:[#allocation3] sm:$0xff]  ;;  %v93_v8 = vlaneseq  ;;  %v62_v9 = vld [vmem:[#allocation6] sm:$0xff]  ;;  %s236_s22 = smov [#allocation8]  }
  0x1a   :  { %v153_v1 = vmul.f32 -1.442695, %v61_v0  ;;  %v73_v12 = vsub.f32 1.0, %v62_v9  ;;  %v154_v21 = vld [vmem:[%s271_s2] ss:$0 sm:$0xff]  ;;  %s139_s23 = sshll.u32 %s236_s22, 4  ;;  %s140_s23 = int_to_ptr.vmem [resolvable:$true] %s139_s23 }
  0x1b   :  { %v94_v13 = vshrl.u32 %v93_v8, 7  ;;  %v99_v14 = vand.u32 127, %v93_v8  ;;  %s208_s25 = scalar_lea.vmem %s140_s23, 16  ;;  %s212_s2 = scalar_lea.vmem %s140_s23, 32 }
  0x1c   :  { %160 = vpow2.f32 %v153_v1  ;;  %p209_p10 = scmp.ne.s32.totalorder %s140_s23, %s208_s25  ;;  %p213_p11 = scmp.lt.s32.totalorder %s140_s23, %s140_s23 }
  0x1d   :  { %vm101_vm0 = vcmp.eq.s32.totalorder %v94_v13, 0  ;;  %vm102_vm1 = vcmp.lt.s32.totalorder %v99_v14, 32  ;;  %p214_p12 = scmp.lt.s32.totalorder %s212_s2, %s208_s25 }
  0x1e   :  { %vm103_vm2 = vmand %vm101_vm0, %vm102_vm1 }
  0x1f   :  { %p215_p13 = por %p214_p12, %p213_p11 }
  0x21   :  { %p216_p0 = pnand %p215_p13, %p209_p10 }
  0x29   :  { %v161_v2 = vpop.eup %160 }
  0x2a   :  { %v66_v3 = vadd.f32 1.0, %v161_v2 }
  0x2c   :  { %162 = vrcp.f32 %v66_v3 }
  0x39   :  { %v163_v4 = vpop.eup %162 }
  0x3a   :  { %v69_v5 = vadd.f32 1e-06, %v163_v4  ;;  %v74_v6 = vsub.f32 1.0, %v163_v4 }
  0x3c   :  { %164 = vlog2.f32 %v69_v5  ;;  %v75_v7 = vadd.f32 1e-06, %v74_v6 }
  0x3e   :  { %166 = vlog2.f32 %v75_v7 }
  0x49   :  { %v165_v10 = vpop.eup %164 }
  0x4a   :  { %v71_v11 = vmul.f32 0.6931472, %v165_v10 }
  0x4b   :  { %v167_v15 = vpop.eup %166 }
  0x4c   :  { %v72_v16 = vmul.f32 %v71_v11, %v62_v9  ;;  %v77_v17 = vmul.f32 0.6931472, %v167_v15 }
  0x4e   :  { %v78_v18 = vmul.f32 %v77_v17, %v73_v12 }
  0x50   :  { %v79_v19 = vadd.f32 %v78_v18, %v72_v16 }
  0x52   :  { %v80_v20 = vsub.f32 0.0, %v79_v19 }
  0x54   :  { %v105_v22 = vsel %vm103_vm2, %v80_v20, 0.0 }
  0x55   :  { %v121_v23 = vmul.f32 %v154_v21, %v105_v22 }
  0x57   :  { %122 = vadd.xlane.f32.xlu0 %v121_v23 }
  0xe0   :  { %v123_v24 = vpop.xlane.xlu0 %122 }
  0xe1   :  { %v124_v25 = vrot.slane %v123_v24, 4 }
  0xe3   :  { %v125_v26 = vadd.f32 %v124_v25, %v123_v24 }
  0xe5   :  { %v126_v27 = vrot.slane %v125_v26, 2 }
  0xe7   :  { %v127_v28 = vadd.f32 %v126_v27, %v125_v26 }
  0xe9   :  { %v128_v29 = vrot.slane %v127_v28, 1 }
  0xeb   :  { %v129_v30 = vadd.f32 %v128_v29, %v127_v28 }
  0xed   :  { %155 = vpush %v129_v30 }
 0x11e   :  { %s156_s24 = spop %155 }
 0x11f   :  { %v131_v31 = vstv %s156_s24 }
 0x120   :  { %132 = vst [vmem:[#allocation8] sm:$0x1] %v131_v31 }
 0x121   :  { %219 = shalt.err (!%p216_p0)
}
 0x122   :  { %142 = dma.vmem_to_hbm [thread:$0]  %s140_s23, 16, %s272_s3, [#allocation5]  }
 0x123   :  { %232 = dma.done.wait [#allocation5], 16  }
 0x124   :  { %233 = vsyncadd [#allocation5], 4294967280 }
 0x125   :  { %146 = vsyncpa [#allocation4], 1 }
 0x126   :  { %147 = vsyncpa [#allocation7], 1 }
 0x127   :  { %148 = vsyncpa [#allocation5], 1 }

</bundles_post_ra>
